<compile_context>
chip_gen: v7x
topology: tpu7x:2x2x1
jax: 0.10.0
libtpu: 0.0.40
codegen_flags: <defaults>
</compile_context>

<pallas_src>
import jax
import jax.numpy as jnp
from jax.experimental import pallas as pl
from jax.experimental.pallas import tpu as pltpu


def _make_normalize_kernel(inv: float):
    """Build an elementwise multiply-by-constant kernel (y = x * (1/max))."""
    inv = float(inv)  # plain Python float -> trace-time literal, not a capture

    def kernel(x_ref, o_ref):
        x = x_ref[...]
        o_ref[...] = (x.astype(jnp.float32) * inv).astype(o_ref.dtype)

    return kernel


def normalize(x: jax.Array, max_value: float) -> jax.Array:
    """Elementwise x / max_value, computed in a Pallas TPU kernel."""
    orig_shape = x.shape

    # Match torch's type promotion: integer/bool input divided by a float
    # scalar tensor produces a floating result.
    if not jnp.issubdtype(x.dtype, jnp.floating):
        x = x.astype(jnp.float32)
    dtype = x.dtype
    itemsize = jnp.dtype(dtype).itemsize
    total = x.size

    inv = 1.0 / float(max_value)  # trace-time constant, full double precision

    LANE = 128
    # Pick the widest lane-dense slab width that evenly divides the flat size,
    # so the common case needs no padding and no trailing slice (each of those
    # would be an extra full HBM read+write pass).
    width = None
    for w in (2048, 1024, 512, 256, 128):
        if total % w == 0:
            width = w
            break

    padded_total = total
    if width is None:
        # Rare ragged case: fall back to padding up to a lane multiple.
        # TODO(synk): handle the ragged tail with a masked partial block
        # instead of a full pad copy.
        width = LANE
        padded_total = ((total + LANE - 1) // LANE) * LANE

    x_flat = jnp.ravel(x)
    if padded_total != total:
        x_flat = jnp.pad(x_flat, (0, padded_total - total))
    rows = padded_total // width
    x2d = x_flat.reshape(rows, width)

    # ~2 MiB per block: double-buffered in + out ~= 8 MiB of VMEM, safely under
    # the scoped default on every generation, while still large enough to
    # amortize the ~0.35 us per-grid-step overhead.
    target_block_bytes = 2 * 1024 * 1024
    tile_r = max(8, target_block_bytes // (width * itemsize))
    tile_r = (tile_r // 8) * 8          # keep the sublane dim a multiple of 8
    if tile_r >= rows:
        tile_r = rows                   # single block == full array (small input)
    grid_r = pl.cdiv(rows, tile_r)      # partial last block is masked by Pallas

    out2d = pl.pallas_call(
        _make_normalize_kernel(inv),
        out_shape=jax.ShapeDtypeStruct((rows, width), dtype),
        grid=(grid_r,),
        in_specs=[pl.BlockSpec((tile_r, width), lambda i: (i, 0))],
        out_specs=pl.BlockSpec((tile_r, width), lambda i: (i, 0)),
        compiler_params=pltpu.CompilerParams(
            dimension_semantics=("parallel",)),
    )(x2d)

    if padded_total != total:
        out_flat = out2d.reshape(-1)[:total]
        return out_flat.reshape(orig_shape)
    return out2d.reshape(orig_shape)


if __name__ == "__main__":
    key = jax.random.PRNGKey(0)
    # Small NCHW input consistent with a conv-style pipeline.
    x = jax.random.normal(key, (2, 4, 16, 16), dtype=jnp.float32) * 255.0
    max_value = 255.0

    y = normalize(x, max_value)
    jax.block_until_ready(y)

    # Cross-check against plain JAX reference.
    ref = x / jnp.asarray(max_value, dtype=x.dtype)
    assert y.shape == x.shape and y.dtype == x.dtype
    assert jnp.allclose(y, ref, rtol=1e-6, atol=1e-6)

    print("KERNEL_OK")
</pallas_src>

<mosaic_0001>
module attributes {stable_mosaic.version = 11 : i64} {
  func.func @kernel(%arg0: i32, %arg1: memref<1x2048xf32, #tpu.memory_space<vmem>>, %arg2: memref<1x2048xf32, #tpu.memory_space<vmem>>) attributes {dimension_semantics = [#tpu.dimension_semantics<parallel>], iteration_bounds = array<i64: 1>, scalar_prefetch = 0 : i64, scratch_operands = 0 : i64, tpu.core_type = #tpu.core_type<tc>, window_params = [{transform_indices = @transform_0, window_bounds = array<i64: 1, 2048>}, {transform_indices = @transform_1, window_bounds = array<i64: 1, 2048>}]} {
    %c0 = arith.constant 0 : index
    %c0_0 = arith.constant 0 : index
    %0 = vector.load %arg1[%c0, %c0_0] : memref<1x2048xf32, #tpu.memory_space<vmem>>, vector<1x2048xf32>
    %cst = arith.constant 0.00392156886 : f32
    %1 = vector.broadcast %cst : f32 to vector<1x2048xf32>
    %2 = arith.mulf %0, %1 : vector<1x2048xf32>
    %c0_1 = arith.constant 0 : index
    %c0_2 = arith.constant 0 : index
    %3 = vector.load %arg2[%c0_1, %c0_2] : memref<1x2048xf32, #tpu.memory_space<vmem>>, vector<1x2048xf32>
    tpu.vector_store %arg2[%c0_1, %c0_2], %2 {strides = array<i32>} : memref<1x2048xf32, #tpu.memory_space<vmem>>, vector<1x2048xf32>,
    return
  }
  func.func @transform_0(%arg0: i32) -> (i32, i32) {
    %c0_i32 = arith.constant 0 : i32
    %c0_i32_0 = arith.constant 0 : i32
    return %arg0, %c0_i32 : i32, i32
  }
  func.func @transform_1(%arg0: i32) -> (i32, i32) {
    %c0_i32 = arith.constant 0 : i32
    %c0_i32_0 = arith.constant 0 : i32
    return %arg0, %c0_i32 : i32, i32
  }
}

</mosaic_0001>

<bundles_post_ra>
// kernel: tpu_custom_call.1
= control target key start
LH: loop header
LB: loop body
LE: loop exit
PB: predicated region body
PF: predicated region fallthrough
CT: control target
= control target key end

     0   :  { %6 = vsyncpa [#allocation3], 0  ;;  %s128_s0 = inlined_call_operand.hbm [shape: f32[1,2048], index: 0, kind: input, shape index: {}]   ;;  %s129_s1 = inlined_call_operand.hbm [shape: f32[1,2048], index: 1, kind: output, shape index: {}]  }
   0x1   :  { %7 = vsyncpa [#allocation4], 0  ;;  %s92_s6 = smov [#allocation2]   ;;  %s44_s10 = scalar_lea.hbm %s128_s0, 256 }
   0x2   :  { %s14_s7 = sshll.u32 %s92_s6, 4  ;;  %p45_p0 = scmp.ne.s32.totalorder %s128_s0, %s44_s10  ;;  %s15_s7 = int_to_ptr.vmem [resolvable:$true] %s14_s7 }
   0x3   :  { %p48_p1 = scmp.lt.u32.totalorder %s44_s10, %s128_s0 }
   0x5   :  { %p50_p2 = pnand %p48_p1, %p45_p0 }
   0x7   :  { %53 = shalt.err (!%p50_p2)
}
   0x8   :  { %s54_s15 = scalar_lea.vmem %s15_s7, 256  ;;  %p59_p4 = scmp.lt.s32.totalorder %s15_s7, %s15_s7 }
   0x9   :  { %p55_p3 = scmp.ne.s32.totalorder %s15_s7, %s54_s15  ;;  %p60_p5 = scmp.lt.s32.totalorder %s54_s15, %s54_s15 }
   0xb   :  { %p61_p6 = por %p60_p5, %p59_p4 }
   0xd   :  { %p62_p7 = pnand %p61_p6, %p55_p3 }
   0xf   :  { %65 = shalt.err (!%p62_p7)
}
  0x10   :  { %17 = dma.hbm_to_vmem [thread:$0]  %s128_s0, 256, %s15_s7, [#allocation3]  }
  0x11   :  { %88 = dma.done.wait [#allocation3], 256  }
  0x12   :  { %89 = vsyncadd [#allocation3], 4294967040  ;;  %s93_s18 = smov [#allocation5]   ;;  %v21_v0 = vld [vmem:[#allocation2] sm:$0xff]  ;;  %v22_v1 = vld [vmem:[#allocation2 + $0x8] sm:$0xff] }
  0x13   :  { %s33_s19 = sshll.u32 %s93_s18, 4  ;;  %v23_v2 = vmul.f32 0.003921569, %v21_v0  ;;  %v24_v3 = vmul.f32 0.003921569, %v22_v1  ;;  %s34_s19 = int_to_ptr.vmem [resolvable:$true] %s33_s19 }
  0x14   :  { %s66_s20 = scalar_lea.vmem %s34_s19, 256  ;;  %p71_p9 = scmp.lt.s32.totalorder %s34_s19, %s34_s19 }
  0x15   :  { %25 = vst [vmem:[#allocation5] sm:$0xff] %v23_v2  ;;  %26 = vst [vmem:[#allocation5 + $0x8] sm:$0xff] %v24_v3  ;;  %p67_p8 = scmp.ne.s32.totalorder %s34_s19, %s66_s20  ;;  %p72_p10 = scmp.lt.s32.totalorder %s66_s20, %s66_s20 }
  0x17   :  { %p73_p11 = por %p72_p10, %p71_p9 }
  0x19   :  { %p74_p12 = pnand %p73_p11, %p67_p8 }
  0x1b   :  { %77 = shalt.err (!%p74_p12)
}
  0x1c   :  { %s78_s22 = scalar_lea.hbm %s129_s1, 256 }
  0x1d   :  { %p79_p13 = scmp.ne.s32.totalorder %s129_s1, %s78_s22  ;;  %p82_p0 = scmp.lt.u32.totalorder %s78_s22, %s129_s1 }
  0x1f   :  { %p84_p1 = pnand %p82_p0, %p79_p13 }
  0x21   :  { %87 = shalt.err (!%p84_p1)
}
  0x22   :  { %36 = dma.vmem_to_hbm [thread:$0]  %s34_s19, 256, %s129_s1, [#allocation4]  }
  0x23   :  { %90 = dma.done.wait [#allocation4], 256  }
  0x24   :  { %91 = vsyncadd [#allocation4], 4294967040 }
  0x25   :  { %40 = vsyncpa [#allocation3], 1 }
  0x26   :  { %41 = vsyncpa [#allocation4], 1 }

</bundles_post_ra>
